<compile_context>
chip_gen: v6e
topology: v6e:2x2x1
jax: 0.10.0
libtpu: 0.0.40
codegen_flags: <defaults>
</compile_context>

<pallas_src>
import functools

import jax
import jax.numpy as jnp
from jax.experimental import pallas as pl
from jax.experimental.pallas import tpu as pltpu


_LANE = 128          # lane width
_SUBLANE_BF16 = 16   # bf16 sublane packing (2x the f32 sublane of 8)


def _round_up(x, m):
    return ((x + m - 1) // m) * m


def _pad_axis(x, axis, target):
    pad = target - x.shape[axis]
    if pad == 0:
        return x
    widths = [(0, 0)] * x.ndim
    widths[axis] = (0, pad)
    return jnp.pad(x, widths)


# ----------------------------------------------------------------------------
# Pallas kernel: one guided Attn unit for a batch tile.
# ----------------------------------------------------------------------------
def _guided_attn_kernel(x_ref, g_ref, wx_ref, bx_ref, wg_ref, bg_ref, whx_ref,
                        out_ref, *, s_valid, use_mxu_ctx):
    # x_ref   : [Bt, S, F] bf16  image-feature tile
    # g_ref   : [Bt, G]    f32   guidance tile
    # wx_ref  : [F, H] bf16, bx_ref : [1, H] f32
    # wg_ref  : [G, H] f32,  bg_ref : [1, H] f32
    # whx_ref : [1, H] f32   (W_hx stored lane-major; its scalar bias is
    #                         dropped: softmax is shift-invariant)
    # out_ref : [Bt, F] f32
    Bt, S, F = x_ref.shape
    H = wx_ref.shape[1]

    x = x_ref[...]                                           # [Bt, S, F] bf16
    g = g_ref[...]                                           # [Bt, G]    f32

    # feat = X @ W_x : single MXU matmul per tile, bf16 in / f32 accumulation.
    feat = jnp.dot(x.reshape(Bt * S, F), wx_ref[...],
                   preferred_element_type=jnp.float32) + bx_ref[...]      # [Bt*S, H]
    # g_emb = g @ W_g : tiny f32 matmul, once per batch row.
    g_emb = jnp.dot(g, wg_ref[...],
                    preferred_element_type=jnp.float32) + bg_ref[...]     # [Bt, H]
    hidden = jnp.tanh(feat.reshape(Bt, S, H) + g_emb[:, None, :])         # [Bt, S, H]

    # Rank-1 score via VPU multiply + lane reduction; logits stay lane-major
    # as [Bt, S] so the softmax max/sum reduce along lanes.
    w_row = whx_ref[...].reshape(1, 1, H)
    score = jnp.sum(hidden * w_row, axis=-1)                              # [Bt, S]

    if s_valid < S:  # static branch: mask zero-padded sequence positions
        lane = jax.lax.broadcasted_iota(jnp.int32, (Bt, S), 1)
        score = jnp.where(lane < s_valid, score, jnp.float32(-1e30))

    # Softmax over the sequence: one exact reciprocal per row, then a multiply.
    m = jnp.max(score, axis=-1, keepdims=True)
    e = jnp.exp(score - m)
    attn = e * (1.0 / jnp.sum(e, axis=-1, keepdims=True))                 # [Bt, S]

    if use_mxu_ctx:
        # Large-S path: batched rank-1 matmuls on the MXU.
        ctx = jnp.einsum("bqs,bsf->bqf", attn.astype(x.dtype)[:, None, :], x,
                         preferred_element_type=jnp.float32)[:, 0, :]
    else:
        # Small-S path: VPU multiply + sublane reduce (avoids per-row tiny
        # matmuls and their MXU pipeline latency).
        ctx = jnp.sum(attn[:, :, None] * x.astype(jnp.float32), axis=1)   # [Bt, F]
    out_ref[...] = ctx.astype(out_ref.dtype)


def _vmem_limit_bytes(b_tile, s, f, g, h):
    bf16, f32 = 2, 4
    x_tiles = 2 * b_tile * s * f * bf16          # double-buffered X tile
    g_tiles = 2 * b_tile * g * f32               # double-buffered guidance tile
    out_tiles = 2 * b_tile * f * f32             # double-buffered output tile
    weights = f * h * bf16 + g * h * f32 + 3 * h * f32   # single-buffered
    interm = b_tile * s * (2 * h + f) * f32 + 8 * b_tile * s * f32
    est = x_tiles + g_tiles + out_tiles + weights + interm
    # 2x headroom; floor 32 MiB (v5e scoped default is only 16 MiB), cap at
    # v7x's 64 MiB physical VMEM so the same limit is safe on all generations.
    return int(min(64 * 2**20, max(32 * 2**20, 2 * est)))


def guided_attn_pallas(X, g, wx, bx, wg, bg, whx, *, b_tile=8):
    """Guided Attn unit: X [B,S,F] f32, g [B,G] f32, whx [H,1] -> [B,F] f32."""
    B, S, F = X.shape
    G = g.shape[1]
    H = wx.shape[1]

    # Lane-dense / MXU-friendly padded shapes (exact: pads are zero or masked).
    S_pad = _round_up(S, _SUBLANE_BF16)
    F_pad = _round_up(F, _LANE)
    G_pad = _round_up(G, _LANE)
    H_pad = _round_up(H, _LANE)
    B_pad = _round_up(B, b_tile)

    # bf16 for the dominant traffic (X, W_x); everything else stays f32.
    Xp = _pad_axis(_pad_axis(_pad_axis(X, 2, F_pad), 1, S_pad), 0, B_pad)
    Xp = Xp.astype(jnp.bfloat16)
    gp = _pad_axis(_pad_axis(g, 1, G_pad), 0, B_pad).astype(jnp.float32)
    wxp = _pad_axis(_pad_axis(wx, 1, H_pad), 0, F_pad).astype(jnp.bfloat16)
    bxp = _pad_axis(bx, 1, H_pad).astype(jnp.float32)
    wgp = _pad_axis(_pad_axis(wg, 1, H_pad), 0, G_pad).astype(jnp.float32)
    bgp = _pad_axis(bg, 1, H_pad).astype(jnp.float32)
    whxp = _pad_axis(whx.reshape(1, H), 1, H_pad).astype(jnp.float32)

    grid = (B_pad // b_tile,)
    use_mxu_ctx = S_pad > 128

    def resident(shape):
        # Grid-invariant operand: constant index_map, single-buffered.
        return pl.BlockSpec(shape, lambda i: (0,) * len(shape),
                            pipeline_mode=pl.Buffered(1))

    out = pl.pallas_call(
        functools.partial(_guided_attn_kernel, s_valid=S,
                          use_mxu_ctx=use_mxu_ctx),
        out_shape=jax.ShapeDtypeStruct((B_pad, F_pad), jnp.float32),
        grid=grid,
        in_specs=[
            pl.BlockSpec((b_tile, S_pad, F_pad), lambda i: (i, 0, 0)),  # X tile
            pl.BlockSpec((b_tile, G_pad), lambda i: (i, 0)),            # g tile
            resident((F_pad, H_pad)),                                   # W_x
            resident((1, H_pad)),                                       # b_x
            resident((G_pad, H_pad)),                                   # W_g
            resident((1, H_pad)),                                       # b_g
            resident((1, H_pad)),                                       # W_hx row
        ],
        out_specs=pl.BlockSpec((b_tile, F_pad), lambda i: (i, 0)),
        compiler_params=pltpu.CompilerParams(
            dimension_semantics=("parallel",),
            vmem_limit_bytes=_vmem_limit_bytes(b_tile, S_pad, F_pad,
                                               G_pad, H_pad)),
    )(Xp, gp, wxp, bxp, wgp, bgp, whxp)
    return out[:B, :F]


# ----------------------------------------------------------------------------
# Parameter construction (deterministic, in-script; matches nn.Linear init).
# ----------------------------------------------------------------------------
def _linear_params(key, fan_in, fan_out):
    k_w, k_b = jax.random.split(key)
    bound = 1.0 / jnp.sqrt(jnp.float32(fan_in))
    w = jax.random.uniform(k_w, (fan_in, fan_out), jnp.float32, -bound, bound)
    b = jax.random.uniform(k_b, (1, fan_out), jnp.float32, -bound, bound)
    return w, b


def make_alter_coattn_params(key, num_hidden, img_feat_size, ques_feat_size):
    keys = jax.random.split(key, 8)
    p = {}
    p["a1_wx"], p["a1_bx"] = _linear_params(keys[0], ques_feat_size, num_hidden)
    p["a1_whx"], p["a1_bhx"] = _linear_params(keys[1], num_hidden, 1)
    p["a2_wx"], p["a2_bx"] = _linear_params(keys[2], img_feat_size, num_hidden)
    p["a2_wg"], p["a2_bg"] = _linear_params(keys[3], ques_feat_size, num_hidden)
    p["a2_whx"], p["a2_bhx"] = _linear_params(keys[4], num_hidden, 1)
    p["a3_wx"], p["a3_bx"] = _linear_params(keys[5], ques_feat_size, num_hidden)
    p["a3_wg"], p["a3_bg"] = _linear_params(keys[6], img_feat_size, num_hidden)
    p["a3_whx"], p["a3_bhx"] = _linear_params(keys[7], num_hidden, 1)
    return p


# ----------------------------------------------------------------------------
# AlterCoAttn forward.
# ----------------------------------------------------------------------------
@jax.jit
def alter_coattn_forward(ques_feat, img_feat, params):
    """ques_feat [B,Q], img_feat [B,S,I] -> (ques_attn [B,Q], img_attn [B,I])."""
    # attn1 / attn3: softmax over a length-1 sequence is exactly 1 and dropout
    # is inference-mode identity -> output == ques_feat bit-exactly.
    ques_self_attn = ques_feat                               # attn1 (exact skip)
    img_attn_feat = guided_attn_pallas(
        img_feat, ques_self_attn,
        params["a2_wx"], params["a2_bx"], params["a2_wg"], params["a2_bg"],
        params["a2_whx"])                                    # attn2 (Pallas)
    ques_attn_feat = ques_feat                               # attn3 (exact skip)
    return ques_attn_feat, img_attn_feat


# ----------------------------------------------------------------------------
# Pure-JAX reference (all three attentions with the real weights).
# x_dtype controls only attn2's X/W_x precision (bf16 = kernel-consistent).
# ----------------------------------------------------------------------------
def _attn_ref(X, g, wx, bx, wg, bg, whx, bhx, x_dtype=jnp.float32):
    Xc = X.astype(x_dtype)
    feat = jnp.einsum("bsf,fh->bsh", Xc, wx.astype(x_dtype),
                      preferred_element_type=jnp.float32) + bx
    if g is not None:
        feat = feat + (jnp.dot(g, wg, preferred_element_type=jnp.float32)
                       + bg)[:, None, :]
    hidden = jnp.tanh(feat)
    score = jnp.einsum("bsh,hk->bsk", hidden, whx,
                       preferred_element_type=jnp.float32) + bhx      # [B,S,1]
    attn = jax.nn.softmax(score, axis=1)
    return jnp.einsum("bs,bsf->bf", attn[..., 0], Xc.astype(jnp.float32))


def alter_coattn_ref(ques_feat, img_feat, params, x_dtype=jnp.float32):
    ques_seq = ques_feat[:, None, :]
    q_self = _attn_ref(ques_seq, None, params["a1_wx"], params["a1_bx"],
                       None, None, params["a1_whx"], params["a1_bhx"])
    v_hat = _attn_ref(img_feat, q_self, params["a2_wx"], params["a2_bx"],
                      params["a2_wg"], params["a2_bg"],
                      params["a2_whx"], params["a2_bhx"], x_dtype=x_dtype)
    q_hat = _attn_ref(ques_seq, v_hat, params["a3_wx"], params["a3_bx"],
                      params["a3_wg"], params["a3_bg"],
                      params["a3_whx"], params["a3_bhx"])
    return q_hat, v_hat


if __name__ == "__main__":
    # Small, module-consistent shapes (B chosen so the batch grid has 2 steps).
    B = 16                # batch
    S = 16                # image sequence length (e.g. 4x4 spatial grid)
    IMG_FEAT = 64         # img_feat_size
    QUES_FEAT = 32        # ques_feat_size
    HIDDEN = 32           # num_hidden

    key = jax.random.PRNGKey(0)
    k_q, k_i, k_p = jax.random.split(key, 3)
    ques_feat = jax.random.normal(k_q, (B, QUES_FEAT), jnp.float32)
    img_feat = jax.random.normal(k_i, (B, S, IMG_FEAT), jnp.float32)
    params = make_alter_coattn_params(k_p, HIDDEN, IMG_FEAT, QUES_FEAT)

    ques_attn, img_attn = alter_coattn_forward(ques_feat, img_feat, params)
    jax.block_until_ready((ques_attn, img_attn))

    assert ques_attn.shape == (B, QUES_FEAT) and img_attn.shape == (B, IMG_FEAT)

    # (1) kernel-consistent reference (attn2 X/W_x bf16-rounded like the kernel)
    ref_q_b, ref_v_b = alter_coattn_ref(ques_feat, img_feat, params,
                                        x_dtype=jnp.bfloat16)
    assert jnp.allclose(ques_attn, ref_q_b, atol=1e-5, rtol=1e-5)
    assert jnp.allclose(img_attn, ref_v_b, atol=5e-4, rtol=5e-4)

    # (2) full-f32 module reference: loose check (only bf16 input rounding).
    ref_q, ref_v = alter_coattn_ref(ques_feat, img_feat, params,
                                    x_dtype=jnp.float32)
    assert jnp.allclose(ques_attn, ref_q, atol=1e-5, rtol=1e-5)
    assert jnp.allclose(img_attn, ref_v, atol=5e-2, rtol=5e-2)

    print("KERNEL_OK")
</pallas_src>

<mosaic_0001>
module attributes {stable_mosaic.version = 11 : i64} {
  func.func @_guided_attn_kernel(%arg0: i32, %arg1: memref<8x16x128xbf16, #tpu.memory_space<vmem>>, %arg2: memref<8x128xf32, #tpu.memory_space<vmem>>, %arg3: memref<128x128xbf16, #tpu.memory_space<vmem>>, %arg4: memref<1x128xf32, #tpu.memory_space<vmem>>, %arg5: memref<128x128xf32, #tpu.memory_space<vmem>>, %arg6: memref<1x128xf32, #tpu.memory_space<vmem>>, %arg7: memref<1x128xf32, #tpu.memory_space<vmem>>, %arg8: memref<8x128xf32, #tpu.memory_space<vmem>>) attributes {dimension_semantics = [#tpu.dimension_semantics<parallel>], iteration_bounds = array<i64: 2>, scalar_prefetch = 0 : i64, scratch_operands = 0 : i64, tpu.core_type = #tpu.core_type<tc>, window_params = [{transform_indices = @transform_0, window_bounds = array<i64: 8, 16, 128>}, {transform_indices = @transform_1, window_bounds = array<i64: 8, 128>}, {pipeline_mode = #tpu.pipeline_mode<synchronous>, transform_indices = @transform_2, window_bounds = array<i64: 128, 128>}, {pipeline_mode = #tpu.pipeline_mode<synchronous>, transform_indices = @transform_3, window_bounds = array<i64: 1, 128>}, {pipeline_mode = #tpu.pipeline_mode<synchronous>, transform_indices = @transform_4, window_bounds = array<i64: 128, 128>}, {pipeline_mode = #tpu.pipeline_mode<synchronous>, transform_indices = @transform_5, window_bounds = array<i64: 1, 128>}, {pipeline_mode = #tpu.pipeline_mode<synchronous>, transform_indices = @transform_6, window_bounds = array<i64: 1, 128>}, {transform_indices = @transform_7, window_bounds = array<i64: 8, 128>}]} {
    %c0 = arith.constant 0 : index
    %c0_0 = arith.constant 0 : index
    %c0_1 = arith.constant 0 : index
    %0 = vector.load %arg1[%c0, %c0_0, %c0_1] : memref<8x16x128xbf16, #tpu.memory_space<vmem>>, vector<8x16x128xbf16>
    %c0_2 = arith.constant 0 : index
    %c0_3 = arith.constant 0 : index
    %1 = vector.load %arg2[%c0_2, %c0_3] : memref<8x128xf32, #tpu.memory_space<vmem>>, vector<8x128xf32>
    %2 = vector.shape_cast %0 : vector<8x16x128xbf16> to vector<128x128xbf16>
    %c0_4 = arith.constant 0 : index
    %c0_5 = arith.constant 0 : index
    %3 = vector.load %arg3[%c0_4, %c0_5] : memref<128x128xbf16, #tpu.memory_space<vmem>>, vector<128x128xbf16>
    %cst = arith.constant dense<0.000000e+00> : vector<128x128xf32>
    %4 = tpu.matmul %2, %3, %cst {dimension_numbers = #tpu.dot_dimension_numbers<[1], [0], [0], [1], [0, 0, 1, 1], [], []>} : vector<128x128xbf16>, vector<128x128xbf16>, vector<128x128xf32> -> vector<128x128xf32>
    %c0_6 = arith.constant 0 : index
    %c0_7 = arith.constant 0 : index
    %5 = vector.load %arg4[%c0_6, %c0_7] : memref<1x128xf32, #tpu.memory_space<vmem>>, vector<1x128xf32>
    %6 = vector.broadcast %5 : vector<1x128xf32> to vector<128x128xf32>
    %7 = arith.addf %4, %6 : vector<128x128xf32>
    %c0_8 = arith.constant 0 : index
    %c0_9 = arith.constant 0 : index
    %8 = vector.load %arg5[%c0_8, %c0_9] : memref<128x128xf32, #tpu.memory_space<vmem>>, vector<128x128xf32>
    %cst_10 = arith.constant dense<0.000000e+00> : vector<8x128xf32>
    %9 = tpu.matmul %1, %8, %cst_10 {dimension_numbers = #tpu.dot_dimension_numbers<[1], [0], [0], [1], [0, 0, 1, 1], [], []>} : vector<8x128xf32>, vector<128x128xf32>, vector<8x128xf32> -> vector<8x128xf32>
    %c0_11 = arith.constant 0 : index
    %c0_12 = arith.constant 0 : index
    %10 = vector.load %arg6[%c0_11, %c0_12] : memref<1x128xf32, #tpu.memory_space<vmem>>, vector<1x128xf32>
    %11 = vector.broadcast %10 : vector<1x128xf32> to vector<8x128xf32>
    %12 = arith.addf %9, %11 : vector<8x128xf32>
    %13 = vector.shape_cast %7 : vector<128x128xf32> to vector<8x16x128xf32>
    %14 = vector.shape_cast %12 : vector<8x128xf32> to vector<8x1x128xf32>
    %15 = vector.broadcast %14 : vector<8x1x128xf32> to vector<8x16x128xf32>
    %16 = arith.addf %13, %15 : vector<8x16x128xf32>
    %17 = math.tanh %16 : vector<8x16x128xf32>
    %c0_13 = arith.constant 0 : index
    %c0_14 = arith.constant 0 : index
    %18 = vector.load %arg7[%c0_13, %c0_14] : memref<1x128xf32, #tpu.memory_space<vmem>>, vector<1x128xf32>
    %19 = vector.shape_cast %18 : vector<1x128xf32> to vector<1x1x128xf32>
    %20 = vector.broadcast %19 : vector<1x1x128xf32> to vector<8x16x128xf32>
    %21 = arith.mulf %17, %20 : vector<8x16x128xf32>
    %cst_15 = arith.constant dense<0.000000e+00> : vector<8x16xf32>
    %22 = vector.multi_reduction <add>, %21, %cst_15 [2] : vector<8x16x128xf32> to vector<8x16xf32>
    %cst_16 = arith.constant dense<0xFF800000> : vector<8xf32>
    %23 = vector.multi_reduction <maximumf>, %22, %cst_16 [1] : vector<8x16xf32> to vector<8xf32>
    %24 = vector.shape_cast %23 : vector<8xf32> to vector<8x1xf32>
    %25 = vector.broadcast %24 : vector<8x1xf32> to vector<8x16xf32>
    %26 = arith.subf %22, %25 : vector<8x16xf32>
    %27 = math.exp %26 : vector<8x16xf32>
    %cst_17 = arith.constant dense<0.000000e+00> : vector<8xf32>
    %28 = vector.multi_reduction <add>, %27, %cst_17 [1] : vector<8x16xf32> to vector<8xf32>
    %29 = vector.shape_cast %28 : vector<8xf32> to vector<8x1xf32>
    %cst_18 = arith.constant 1.000000e+00 : f32
    %30 = vector.broadcast %cst_18 : f32 to vector<8x1xf32>
    %31 = arith.divf %30, %29 : vector<8x1xf32>
    %32 = vector.broadcast %31 : vector<8x1xf32> to vector<8x16xf32>
    %33 = arith.mulf %27, %32 : vector<8x16xf32>
    %34 = vector.shape_cast %33 : vector<8x16xf32> to vector<8x16x1xf32>
    %35 = arith.extf %0 : vector<8x16x128xbf16> to vector<8x16x128xf32>
    %36 = vector.broadcast %34 : vector<8x16x1xf32> to vector<8x16x128xf32>
    %37 = arith.mulf %36, %35 : vector<8x16x128xf32>
    %cst_19 = arith.constant dense<0.000000e+00> : vector<8x128xf32>
    %38 = vector.multi_reduction <add>, %37, %cst_19 [1] : vector<8x16x128xf32> to vector<8x128xf32>
    %c0_20 = arith.constant 0 : index
    %c0_21 = arith.constant 0 : index
    %39 = vector.load %arg8[%c0_20, %c0_21] : memref<8x128xf32, #tpu.memory_space<vmem>>, vector<8x128xf32>
    tpu.vector_store %arg8[%c0_20, %c0_21], %38 {strides = array<i32>} : memref<8x128xf32, #tpu.memory_space<vmem>>, vector<8x128xf32>,
    return
  }
  func.func @transform_0(%arg0: i32) -> (i32, i32, i32) {
    %c0_i32 = arith.constant 0 : i32
    %c0_i32_0 = arith.constant 0 : i32
    %c0_i32_1 = arith.constant 0 : i32
    return %arg0, %c0_i32, %c0_i32_0 : i32, i32, i32
  }
  func.func @transform_1(%arg0: i32) -> (i32, i32) {
    %c0_i32 = arith.constant 0 : i32
    %c0_i32_0 = arith.constant 0 : i32
    return %arg0, %c0_i32 : i32, i32
  }
  func.func @transform_2(%arg0: i32) -> (i32, i32) {
    %c0_i32 = arith.constant 0 : i32
    %c0_i32_0 = arith.constant 0 : i32
    %c0_i32_1 = arith.constant 0 : i32
    return %c0_i32, %c0_i32_0 : i32, i32
  }
  func.func @transform_3(%arg0: i32) -> (i32, i32) {
    %c0_i32 = arith.constant 0 : i32
    %c0_i32_0 = arith.constant 0 : i32
    %c0_i32_1 = arith.constant 0 : i32
    return %c0_i32, %c0_i32_0 : i32, i32
  }
  func.func @transform_4(%arg0: i32) -> (i32, i32) {
    %c0_i32 = arith.constant 0 : i32
    %c0_i32_0 = arith.constant 0 : i32
    %c0_i32_1 = arith.constant 0 : i32
    return %c0_i32, %c0_i32_0 : i32, i32
  }
  func.func @transform_5(%arg0: i32) -> (i32, i32) {
    %c0_i32 = arith.constant 0 : i32
    %c0_i32_0 = arith.constant 0 : i32
    %c0_i32_1 = arith.constant 0 : i32
    return %c0_i32, %c0_i32_0 : i32, i32
  }
  func.func @transform_6(%arg0: i32) -> (i32, i32) {
    %c0_i32 = arith.constant 0 : i32
    %c0_i32_0 = arith.constant 0 : i32
    %c0_i32_1 = arith.constant 0 : i32
    return %c0_i32, %c0_i32_0 : i32, i32
  }
  func.func @transform_7(%arg0: i32) -> (i32, i32) {
    %c0_i32 = arith.constant 0 : i32
    %c0_i32_0 = arith.constant 0 : i32
    return %arg0, %c0_i32 : i32, i32
  }
}

</mosaic_0001>

<bundles_post_ra>
// kernel: alter_coattn_forward.1
= control target key start
LH: loop header
LB: loop body
LE: loop exit
PB: predicated region body
PF: predicated region fallthrough
CT: control target
= control target key end

     0   :  { %12 = vsyncpa [#allocation3], 0  ;;  %s2401_s0 = inlined_call_operand.vmem [shape: bf16[16,16,128], index: 0, kind: input, shape index: {}]   ;;  %s2402_s1 = inlined_call_operand.vmem [shape: f32[16,128], index: 1, kind: input, shape index: {}]   ;;  %s2403_s2 = inlined_call_operand.vmem [shape: bf16[128,128], index: 2, kind: input, shape index: {}]   ;;  %s2404_s3 = inlined_call_operand.vmem [shape: f32[1,128], index: 3, kind: input, shape index: {}]   ;;  %s2405_s4 = inlined_call_operand.vmem [shape: f32[128,128], index: 4, kind: input, shape index: {}]   ;;  %s2406_s5 = inlined_call_operand.vmem [shape: f32[1,128], index: 5, kind: input, shape index: {}]   ;;  %s2407_s6 = inlined_call_operand.vmem [shape: f32[1,128], index: 6, kind: input, shape index: {}]   ;;  %s2408_s7 = inlined_call_operand.hbm [shape: f32[16,128], index: 7, kind: output, shape index: {}]  }
   0x1   :  { %14 = vsyncpa [#allocation3 + $0x1], 0  ;;  %s1854_s24 = smov 0   ;;  %s1856_s25 = smov 0  }
   0x2   :  { %s1858_s26 = smov 0   ;;  %s1860_s27 = smov 0  }
   0x3 LB: > { %s1875_s28 = sadd.s32 4294967295, %s1807_s27   ;;  %s1479_s29 = sadd.s32 4294967294, %s1807_s27   ;;  %s1807_s27 = sphi %s1860_s27, %s2414_s27   ;;  %s1803_s26 = sphi %s1858_s26, %s2413_s26   ;;  %s1799_s25 = sphi %s1856_s25, %s2412_s25   ;;  %s1795_s24 = sphi %s1854_s24, %s2411_s24  }
   0x4   : > { %s1879_s30 = sadd.s32 1, %s1807_s27   ;;  %s184_s8 = sadd.s32 1, %s1803_s26 }
   0x5   : > { %s181_s9 = ssub.s32 %s1807_s27, %s1879_s30  ;;  %p194_p0 = scmp.ne.s32.totalorder %s1803_s26, %s1799_s25 }
   0x6   : > { %p182_p1 = scmp.eq.s32.totalorder %s181_s9, 0  ;;  %p195_p2 = scmp.eq.s32.totalorder %s1875_s28, 1 }
   0x7   : > { %p200_p3 = scmp.ne.s32.totalorder %s1799_s25, %s1795_s24  ;;  %p201_p4 = scmp.eq.s32.totalorder %s1479_s29, 1 }
   0x8   : > { %s1890_s10 = scalar_select %p182_p1, %s1803_s26, %s184_s8  }
   0x9   : > { %p1892_p5 = por %p195_p2, %p194_p0  ;;  %p1896_p6 = por %p201_p4, %p200_p3 }
   0xa   : > { %p1482_p7 = scmp.ge.s32.totalorder %s1807_s27, 1  ;;  %p251_p8 = scmp.lt.s32.totalorder %s1807_s27, 3 }
   0xc   : > { %p252_p9 = pnand %p1482_p7, %p251_p8 }
   0xd   : > { %s1484_s19 = sshll.u32 (!%p252_p9), %s1875_s28, 3  ;;  %p295_p11 = scmp.lt.s32.totalorder (!%p252_p9), %s1875_s28, 1 }
   0xe   : > { %255 = sbr.rel (%p252_p9) target bundleno = 1137 (0x471), region = 48  ;;  %p289_p10 = scmp.lt.s32.totalorder (!%p252_p9), %s1484_s19, 15 }
   0xf   : > { %s285_s23 = sand.u32 (!%p252_p9), 1, %s1799_s25   ;;  %s1508_s9 = sshll.u32 (!%p252_p9), %s1875_s28, 7 }
  0x13   : > { %v548_v0 = vld [vmem:[%s2405_s4 + $0x78] sm:$0xff]  ;;  %v1809_v1 = vmov 0.0   ;;  %v547_v3 = vld [vmem:[%s2405_s4 + $0x70] sm:$0xff]  ;;  %vm1810_vm0 = vmmov 0   ;;  %v546_v5 = vld [vmem:[%s2405_s4 + $0x68] sm:$0xff]  ;;  %s2416_s19 = smov (!%p289_p10, %s1484_s19), 15  ;;  %v631_v36 = vlaneseq }
  0x14   : > { %1577 = vmatprep.subr.mxu1 %v1809_v1  ;;  %v1657_v2 = vld [vmem:[%s2403_s2 + $0x38] sm:$0xff]   ;;  %v1658_v4 = vld [vmem:[%s2403_s2 + $0x30] sm:$0xff]   ;;  %1609 = vmatprep.mubr.msk.f32.mxu1 %vm1810_vm0, %v1809_v1  ;;  %v545_v6 = vld [vmem:[%s2405_s4 + $0x60] sm:$0xff]  ;;  %s1511_s16 = sshll.u32 %s2416_s19, 3  ;;  %v1811_v34 = vmov 1966171168  }
  0x15   : > { %1578 = vmatpush3.msra.mxu1 %v548_v0  ;;  %1545 = vmatprep.subr.bf16.mxu0 %v1657_v2  ;;  %v1659_v7 = vld [vmem:[%s2403_s2 + $0x28] sm:$0xff]   ;;  %v544_v8 = vld [vmem:[%s2405_s4 + $0x58] sm:$0xff]  ;;  %v543_v9 = vld [vmem:[%s2405_s4 + $0x50] sm:$0xff]  ;;  %s1942_s29 = scalar_lea.vmem %s2401_s0, %s1511_s16  ;;  %v629_v35 = vunpack.c.l.s4 %v1811_v34  ;;  %v2035_v38 = vshrl.u32 %v631_v36, 7  ;;  %vm830_vm1 = vcmask 130112   ;;  %vm895_vm2 = vcmask 1041409   ;;  %s2363_s16 = scalar_lea.hbm %s2408_s7, %s1508_s9 }
  0x16   : > { %1579 = vmatprep.subr.mxu1 %v1809_v1  ;;  %1546 = vmatpush3.bf16.msra.mxu0 %v1657_v2  ;;  %v1660_v10 = vld [vmem:[%s2403_s2 + $0x20] sm:$0xff]   ;;  %v542_v11 = vld [vmem:[%s2405_s4 + $0x48] sm:$0xff]  ;;  %v1661_v13 = vld [vmem:[%s2403_s2 + $0x18] sm:$0xff]   ;;  %s296_s8 = scalar_select %p295_p11, %s1875_s28, 1  ;;  %vm897_vm3 = vcmask 1042434   ;;  %vm899_vm4 = vcmask 1043459  }
  0x17   : > { %1580 = vmatpush3.msra.mxu1 %v547_v3  ;;  %1547 = vmatprep.subr.bf16.mxu0 %v1658_v4  ;;  %v541_v12 = vld [vmem:[%s2405_s4 + $0x40] sm:$0xff]  ;;  %v540_v15 = vld [vmem:[%s2405_s4 + $0x38] sm:$0xff]  ;;  %v539_v16 = vld [vmem:[%s2405_s4 + $0x30] sm:$0xff]  ;;  %v630_v37 = vunpack.c.0.s8 %v629_v35  ;;  %v2042_v47 = vsub.s32 0, %v2035_v38  ;;  %vm901_vm5 = vcmask 1044484   ;;  %vm903_vm6 = vcmask 1045509  }
  0x18   : > { %1581 = vmatprep.subr.mxu1 %v1809_v1  ;;  %v1956_v14 = vld [vmem:[%s1942_s29] sm:$0xff]   ;;  %v1662_v17 = vld [vmem:[%s2403_s2 + $0x10] sm:$0xff]   ;;  %v538_v18 = vld [vmem:[%s2405_s4 + $0x28] sm:$0xff]  ;;  %s1487_s18 = sshll.u32 %s296_s8, 3  ;;  %vm905_vm7 = vcmask 1046534   ;;  %vm907_vm8 = vcmask 1047559  }
  0x19   : > { %1582 = vmatpush3.msra.mxu1 %v546_v5  ;;  %1561 = vmatprep.mubr.bf16.mxu0 %v1956_v14  ;;  %v537_v19 = vld [vmem:[%s2405_s4 + $0x20] sm:$0xff]  ;;  %v1663_v20 = vld [vmem:[%s2403_s2 + $0x8] sm:$0xff]   ;;  %v536_v21 = vld [vmem:[%s2405_s4 + $0x18] sm:$0xff]  ;;  %s298_s14 = scalar_lea.vmem %s2402_s1, %s1487_s18  ;;  %v633_v40 = vsub.s32 %v630_v37, %v2035_v38  ;;  %vm910_vm9 = vcmask 130048   ;;  %s1483_s19 = sshll.u32 %s285_s23, 3 }
  0x1a   : > { %1583 = vmatprep.subr.mxu1 %v1809_v1  ;;  %1548 = vmatpush3.bf16.msra.mxu0 %v1658_v4  ;;  %v535_v22 = vld [vmem:[%s2405_s4 + $0x10] sm:$0xff]  ;;  %v1664_v23 = vld [vmem:[%s2403_s2] sm:$0xff]   ;;  %v534_v24 = vld [vmem:[%s2405_s4 + $0x8] sm:$0xff]  ;;  %s287_s13 = scalar_lea.vmem [#allocation2], %s1483_s19  ;;  %s1395_s28 = scalar_lea.sflag [#allocation3], %s285_s23 }
  0x1b   : > { %1584 = vmatpush3.msra.mxu1 %v545_v6  ;;  %1549 = vmatprep.subr.bf16.mxu0 %v1659_v7  ;;  %v2002_v25 = vld [vmem:[%s1942_s29 + $0x8] sm:$0xff]   ;;  %v533_v26 = vld [vmem:[%s2405_s4] sm:$0xff]  ;;  %v2009_v27 = vld [vmem:[%s1942_s29 + $0x10] sm:$0xff]   ;;  %s1408_s8 = sshll.u32 %s287_s13, 4  ;;  %s1813_s18 = smov [#allocation2]   ;;  %s1409_s8 = int_to_ptr.vmem [resolvable:$true] %s1408_s8 }
  0x1c   : > { %1585 = vmatprep.subr.mxu1 %v1809_v1  ;;  %v316_v28 = vld [vmem:[%s298_s14] sm:$0xff]  ;;  %v2015_v29 = vld [vmem:[%s1942_s29 + $0x18] sm:$0xff]   ;;  %v2023_v31 = vld [vmem:[%s1942_s29 + $0x28] sm:$0xff]   ;;  %s1747_s17 = scalar_lea.vmem %s1409_s8, 128 }
  0x1d   : > { %1586 = vmatpush3.msra.mxu1 %v544_v8  ;;  %v2018_v30 = vld [vmem:[%s1942_s29 + $0x20] sm:$0xff]   ;;  %v2026_v32 = vld [vmem:[%s1942_s29 + $0x30] sm:$0xff]   ;;  %v2031_v33 = vld [vmem:[%s1942_s29 + $0x38] sm:$0xff]   ;;  %p1748_p12 = scmp.ne.s32.totalorder %s1409_s8, %s1747_s17  ;;  %s1751_s29 = sshll.u32 %s1813_s18, 4  ;;  %s1752_s29 = int_to_ptr.vmem [resolvable:$false] %s1751_s29 }
  0x1e   : > { %1587 = vmatprep.subr.mxu1 %v1809_v1  ;;  %1550 = vmatpush3.bf16.msra.mxu0 %v1659_v7  ;;  %v1505_v39 = vld [vmem:[%s2406_s5] ss:$0 sm:$0xff]  ;;  %s1753_s20 = scalar_lea.vmem %s1752_s29, 256  ;;  %p1754_p1 = scmp.lt.s32.totalorder %s1409_s8, %s1752_s29 }
  0x1f   : > { %1588 = vmatpush3.msra.mxu1 %v543_v9  ;;  %1551 = vmatprep.subr.bf16.mxu0 %v1660_v10  ;;  %v2047_v48 = vld [vmem:[%s2404_s3] ss:$0 sm:$0xff]  ;;  %p1749_p13 = pnand %p1748_p12, %p1892_p5  ;;  %p1755_p2 = scmp.lt.s32.totalorder %s1753_s20, %s1747_s17 }
  0x20   : > { %1589 = vmatprep.subr.mxu1 %v1809_v1  ;;  %v2067_v37 = vld [vmem:[%s2407_s6] ss:$0 sm:$0xff] }
  0x21   : > { %1590 = vmatpush3.msra.mxu1 %v542_v11  ;;  %p1750_p0 = pneg %p1749_p13  ;;  %p1756_p3 = por %p1755_p2, %p1754_p1 }
  0x22   : > { %1591 = vmatprep.subr.mxu1 %v1809_v1  ;;  %1552 = vmatpush3.bf16.msra.mxu0 %v1660_v10 }
  0x23   : > { %1592 = vmatpush3.msra.mxu1 %v541_v12  ;;  %1553 = vmatprep.subr.bf16.mxu0 %v1661_v13  ;;  %p1757_p4 = pnand %p1756_p3, %p1750_p0 }
  0x24   : > { %1593 = vmatprep.subr.mxu1 %v1809_v1 }
  0x25   : > { %1594 = vmatpush3.msra.mxu1 %v540_v15 }
  0x26   : > { %1595 = vmatprep.subr.mxu1 %v1809_v1  ;;  %1554 = vmatpush3.bf16.msra.mxu0 %v1661_v13 }
  0x27   : > { %1596 = vmatpush3.msra.mxu1 %v539_v16  ;;  %1555 = vmatprep.subr.bf16.mxu0 %v1662_v17 }
  0x28   : > { %1597 = vmatprep.subr.mxu1 %v1809_v1 }
  0x29   : > { %1598 = vmatpush3.msra.mxu1 %v538_v18 }
  0x2a   : > { %1599 = vmatprep.subr.mxu1 %v1809_v1  ;;  %1556 = vmatpush3.bf16.msra.mxu0 %v1662_v17 }
  0x2b   : > { %1600 = vmatpush3.msra.mxu1 %v537_v19  ;;  %1557 = vmatprep.subr.bf16.mxu0 %v1663_v20 }
  0x2c   : > { %1601 = vmatprep.subr.mxu1 %v1809_v1 }
  0x2d   : > { %1602 = vmatpush3.msra.mxu1 %v536_v21 }
  0x2e   : > { %1603 = vmatprep.subr.mxu1 %v1809_v1  ;;  %1558 = vmatpush3.bf16.msra.mxu0 %v1663_v20 }
  0x2f   : > { %1604 = vmatpush3.msra.mxu1 %v535_v22  ;;  %1559 = vmatprep.subr.bf16.mxu0 %v1664_v23 }
  0x30   : > { %1605 = vmatprep.subr.mxu1 %v1809_v1 }
  0x31   : > { %1606 = vmatpush3.msra.mxu1 %v534_v24 }
  0x32   : > { %1607 = vmatprep.subr.mxu1 %v1809_v1  ;;  %1560 = vmatpush3.bf16.msra.mxu0 %v1664_v23 }
  0x33   : > { %1608 = vmatpush3.msra.mxu1 %v533_v26 }
  0x34   : > { %1610 = vmatmul.mubr.f32.vlgmr.msra.gmra.mxu1 %v316_v28 }
  0x35   : > { %1562 = vmatmul.mubr.bf16.vlgmr.msra.gmra.mxu0 %v2002_v25 }
  0x36   : > { %1565 = vmatprep.mubr.bf16.mxu0 %v2009_v27 }
  0x3d   : > { %1566 = vmatmul.mubr.bf16.gmra.mxu0 %v2015_v29 }
  0x3e   : > { %1569 = vmatprep.mubr.bf16.mxu0 %v2018_v30 }
  0x45   : > { %1570 = vmatmul.mubr.bf16.gmra.mxu0 %v2023_v31 }
  0x46   : > { %1573 = vmatprep.mubr.bf16.mxu0 %v2026_v32 }
  0x4d   : > { %1574 = vmatmul.mubr.bf16.gmra.mxu0 %v2031_v33 }
  0xf4   : > { %v622_v41 = vpop.f32.mrf.mxu1 }
  0xf5   : > { %v623_v42 = vadd.f32 %v1505_v39, %v622_v41  ;;  %v1563_v43 = vpop.f32.mrf.mxu0 }
  0xf6   : > { %v1611_v44 = vpop.f32.mrf.mxu1  ;;  %v479_v57 = vadd.f32 %v1563_v43, %v2047_v48 }
  0xf7   : > { %v627_v45 = vcombine.high %v623_v42, %v623_v42  ;;  %v634_v46 = vrot.slane %v623_v42, %v633_v40  ;;  %v470_v49 = vpop.f32.mrf.mxu0 }
  0xf8   : > { %v471_v55 = vadd.f32 %v2047_v48, %v470_v49 }
  0xf9   : > { %v642_v50 = vcombine.high %v634_v46, %v634_v46  ;;  %v650_v51 = vrot.slane %v634_v46, %v633_v40  ;;  %v641_v52 = vrot.slane %v627_v45, %v633_v40  ;;  %v1564_v53 = vpop.f32.mrf.mxu0 }
  0xfa   : > { %v482_v58 = vadd.f32 %v1564_v53, %v2047_v48 }
  0xfb   : > { %v664_v54 = vrot.slane %v642_v50, %v633_v40  ;;  %v679_v56 = vrot.slane %v650_v51, %v2042_v47  ;;  %v473_v59 = vpop.f32.mrf.mxu0  ;;  %v643_v0 = vcombine.high %v641_v52, %v641_v52  ;;  %v672_v2 = vcombine.high %v650_v51, %v650_v51 }
  0xfc   : > { %v474_v62 = vadd.f32 %v2047_v48, %v473_v59  ;;  %v657_v21 = vrot.slane %v641_v52, %v633_v40 }
  0xfd   : > { %v683_v60 = vrot.slane %v664_v54, %v2042_v47  ;;  %v716_v61 = vadd.f32 %v679_v56, %v471_v55  ;;  %v674_v63 = vcombine.high %v664_v54, %v664_v54  ;;  %v1567_v1 = vpop.f32.mrf.mxu0  ;;  %v687_v12 = vrot.slane %v672_v2, %v2042_v47 }
  0xfe   : > { %v717_v5 = vadd.f32 %v679_v56, %v474_v62  ;;  %v495_v6 = vadd.f32 %v1567_v1, %v2047_v48  ;;  %v671_v15 = vrot.slane %v643_v0, %v633_v40  ;;  %v695_v39 = vrot.slane %v657_v21, %v2042_v47 }
  0xff   : > { %v718_v3 = vadd.f32 %v683_v60, %v479_v57  ;;  %1681 = vtanh.f32 %v716_v61  ;;  %v719_v4 = vadd.f32 %v683_v60, %v482_v58  ;;  %v691_v7 = vrot.slane %v674_v63, %v2042_v47  ;;  %v486_v8 = vpop.f32.mrf.mxu0 }
 0x100   : > { %v487_v9 = vadd.f32 %v2047_v48, %v486_v8  ;;  %v699_v24 = vrot.slane %v671_v15, %v2042_v47  ;;  %v673_v43 = vcombine.high %v657_v21, %v657_v21  ;;  %v675_v52 = vcombine.high %v671_v15, %v671_v15 }
 0x101   : > { %1683 = vtanh.f32 %v718_v3  ;;  %v722_v10 = vadd.f32 %v691_v7, %v495_v6  ;;  %v1568_v11 = vpop.f32.mrf.mxu0 }
 0x102   : > { %1685 = vtanh.f32 %v719_v4  ;;  %v498_v13 = vadd.f32 %v1568_v11, %v2047_v48  ;;  %v720_v17 = vadd.f32 %v687_v12, %v487_v9  ;;  %v703_v60 = vrot.slane %v673_v43, %v2042_v47 }
 0x103   : > { %1687 = vtanh.f32 %v717_v5  ;;  %v489_v16 = vpop.f32.mrf.mxu0  ;;  %v707_v63 = vrot.slane %v675_v52, %v2042_v47 }
 0x104   : > { %1689 = vtanh.f32 %v722_v10  ;;  %v723_v18 = vadd.f32 %v691_v7, %v498_v13  ;;  %v490_v19 = vadd.f32 %v2047_v48, %v489_v16 }
 0x105   : > { %v1571_v20 = vpop.f32.mrf.mxu0 }
 0x106   : > { %1691 = vtanh.f32 %v723_v18  ;;  %v721_v22 = vadd.f32 %v687_v12, %v490_v19  ;;  %v511_v23 = vadd.f32 %v1571_v20, %v2047_v48 }
 0x107   : > { %v502_v26 = vpop.f32.mrf.mxu0  ;;  %1693 = vtanh.f32 %v720_v17 }
 0x108   : > { %v726_v28 = vadd.f32 %v699_v24, %v511_v23  ;;  %v503_v34 = vadd.f32 %v2047_v48, %v502_v26  ;;  %1695 = vtanh.f32 %v721_v22 }
 0x109   : > { %v1572_v35 = vpop.f32.mrf.mxu0 }
 0x10a   : > { %v514_v40 = vadd.f32 %v1572_v35, %v2047_v48  ;;  %1697 = vtanh.f32 %v726_v28  ;;  %v724_v44 = vadd.f32 %v695_v39, %v503_v34 }
 0x10b   : > { %v505_v42 = vpop.f32.mrf.mxu0 }
 0x10c   : > { %v1682_v41 = vpop.eup %1681  ;;  %v727_v45 = vadd.f32 %v699_v24, %v514_v40  ;;  %v506_v46 = vadd.f32 %v2047_v48, %v505_v42 }
 0x10d   : > { %v755_v49 = vmul.f32 %v1682_v41, %v2067_v37  ;;  %v1575_v51 = vpop.f32.mrf.mxu0 }
 0x10e   : > { %v1684_v50 = vpop.eup %1683  ;;  %1699 = vtanh.f32 %v727_v45  ;;  %v725_v54 = vadd.f32 %v695_v39, %v506_v46  ;;  %v527_v57 = vadd.f32 %v1575_v51, %v2047_v48 }
 0x10f   : > { %v1686_v53 = vpop.eup %1685  ;;  %771 = vadd.xlane.f32.xlu0 %v755_v49  ;;  %v757_v55 = vmul.f32 %v1684_v50, %v2067_v37  ;;  %v518_v58 = vpop.f32.mrf.mxu0  ;;  %1701 = vtanh.f32 %v724_v44  ;;  %v820_v49 = vand.u32 127, %v631_v36 }
 0x110   : > { %v1688_v56 = vpop.eup %1687  ;;  %v519_v59 = vadd.f32 %v2047_v48, %v518_v58  ;;  %1703 = vtanh.f32 %v725_v54  ;;  %v758_v3 = vmul.f32 %v1686_v53, %v2067_v37  ;;  %v730_v5 = vadd.f32 %v707_v63, %v527_v57 }
 0x111   : > { %775 = vadd.xlane.f32.xlu1 %v757_v55  ;;  %v756_v61 = vmul.f32 %v1688_v56, %v2067_v37  ;;  %v1690_v62 = vpop.eup %1689  ;;  %v1576_v0 = vpop.f32.mrf.mxu0  ;;  %v825_v51 = vadd.s32 4294967288, %v820_v49  ;;  %v2117_v55 = vsub.s32 %v820_v49, %v2035_v38 }
 0x112   : > { %v728_v1 = vadd.f32 %v703_v60, %v519_v59  ;;  %v530_v2 = vadd.f32 %v1576_v0, %v2047_v48  ;;  %v761_v8 = vmul.f32 %v1690_v62, %v2067_v37 }
 0x113   : > { %773 = vadd.xlane.f32.xlu0 %v756_v61  ;;  %v1692_v4 = vpop.eup %1691  ;;  %v521_v6 = vpop.f32.mrf.mxu0 }
 0x114   : > { %1705 = vtanh.f32 %v728_v1  ;;  %v522_v7 = vadd.f32 %v2047_v48, %v521_v6  ;;  %v1694_v9 = vpop.eup %1693  ;;  %v731_v10 = vadd.f32 %v707_v63, %v530_v2  ;;  %v762_v12 = vmul.f32 %v1692_v4, %v2067_v37 }
 0x115   : > { %777 = vadd.xlane.f32.xlu1 %v758_v3  ;;  %v1696_v13 = vpop.eup %1695  ;;  %1707 = vtanh.f32 %v730_v5  ;;  %v759_v16 = vmul.f32 %v1694_v9, %v2067_v37 }
 0x116   : > { %v729_v11 = vadd.f32 %v703_v60, %v522_v7  ;;  %v760_v48 = vmul.f32 %v1696_v13, %v2067_v37 }
 0x117   : > { %783 = vadd.xlane.f32.xlu0 %v761_v8  ;;  %v1698_v15 = vpop.eup %1697 }
 0x118   : > { %1709 = vtanh.f32 %v729_v11  ;;  %v765_v18 = vmul.f32 %v1698_v15, %v2067_v37 }
 0x119   : > { %785 = vadd.xlane.f32.xlu1 %v762_v12  ;;  %1711 = vtanh.f32 %v731_v10 }
 0x11b   : > { %779 = vadd.xlane.f32.xlu0 %v759_v16  ;;  %v1700_v17 = vpop.eup %1699 }
 0x11c   : > { %v1702_v19 = vpop.eup %1701  ;;  %v766_v20 = vmul.f32 %v1700_v17, %v2067_v37 }
 0x11d   : > { %781 = vadd.xlane.f32.xlu1 %v760_v48  ;;  %v1704_v21 = vpop.eup %1703  ;;  %v763_v22 = vmul.f32 %v1702_v19, %v2067_v37 }
 0x11e   : > { %v764_v24 = vmul.f32 %v1704_v21, %v2067_v37 }
 0x11f   : > { %791 = vadd.xlane.f32.xlu0 %v765_v18 }
 0x121   : > { %793 = vadd.xlane.f32.xlu1 %v766_v20  ;;  %v1706_v23 = vpop.eup %1705 }
 0x122   : > { %v1708_v26 = vpop.eup %1707  ;;  %v767_v28 = vmul.f32 %v1706_v23, %v2067_v37 }
 0x123   : > { %787 = vadd.xlane.f32.xlu0 %v763_v22  ;;  %v769_v40 = vmul.f32 %v1708_v26, %v2067_v37 }
 0x125   : > { %789 = vadd.xlane.f32.xlu1 %v764_v24  ;;  %v1710_v34 = vpop.eup %1709 }
 0x126   : > { %v768_v35 = vmul.f32 %v1710_v34, %v2067_v37  ;;  %v1712_v39 = vpop.eup %1711 }
 0x127   : > { %795 = vadd.xlane.f32.xlu0 %v767_v28  ;;  %v770_v41 = vmul.f32 %v1712_v39, %v2067_v37  ;;  %v2112_v37 = vsub.s32 %v825_v51, %v2035_v38 }
 0x129   : > { %797 = vadd.xlane.f32.xlu1 %v768_v35 }
 0x12b   : > { %799 = vadd.xlane.f32.xlu0 %v769_v40  ;;  %v1812_v40 = vmov 0  }
 0x12c   : > { %1656 = vset.pattern.permute.xlu0 %v1812_v40  ;;  %1655 = vset.pattern.permute.xlu1 %v1812_v40 }
 0x12d   : > { %801 = vadd.xlane.f32.xlu1 %v770_v41  ;;  %v921_v41 = vsub.s32 1, %v2035_v38 }
 0x198   : > { %v2094_v42 = vpop.xlane.xlu0 %771 }
 0x199   : > { %v824_v62 = vrot.slane %v2094_v42, %v2117_v55 }
 0x19a   : > { %v2096_v43 = vpop.xlane.xlu1 %775 }
 0x19b   : > { %v835_v58 = vrot.slane %v2096_v43, %v2117_v55 }
 0x19c   : > { %v2098_v44 = vpop.xlane.xlu0 %773 }
 0x19d   : > { %v829_v59 = vrot.slane %v2098_v44, %v2112_v37 }
 0x19e   : > { %v2100_v45 = vpop.xlane.xlu1 %777 }
 0x19f   : > { %v839_v56 = vrot.slane %v2100_v45, %v2112_v37  ;;  %v831_v2 = vsel %vm830_vm1, %v829_v59, %v824_v62 }
 0x1a0   : > { %v2102_v46 = vpop.xlane.xlu0 %783 }
 0x1a1   : > { %v840_v63 = vsel %vm830_vm1, %v839_v56, %v835_v58  ;;  %v853_v8 = vrot.slane %v2102_v46, %v2117_v55 }
 0x1a2   : > { %v2105_v50 = vpop.xlane.xlu1 %785  ;;  %v896_v5 = vsel %vm895_vm2, %v840_v63, %v831_v2  ;;  %v941_v63 = vsub.s32 6, %v2035_v38 }
 0x1a3   : > { %v857_v3 = vrot.slane %v2105_v50, %v2112_v37 }
 0x1a4   : > { %v2107_v52 = vpop.xlane.xlu0 %779 }
 0x1a5   : > { %v844_v60 = vrot.slane %v2107_v52, %v2117_v55  ;;  %v858_v12 = vsel %vm830_vm1, %v857_v3, %v853_v8  ;;  %v929_v8 = vsub.s32 3, %v2035_v38 }
 0x1a6   : > { %v2109_v53 = vpop.xlane.xlu1 %781 }
 0x1a7   : > { %v848_v36 = vrot.slane %v2109_v53, %v2112_v37 }
 0x1a8   : > { %v2114_v54 = vpop.xlane.xlu0 %791 }
 0x1a9   : > { %v849_v0 = vsel %vm830_vm1, %v848_v36, %v844_v60  ;;  %v871_v18 = vrot.slane %v2114_v54, %v2117_v55  ;;  %v937_v36 = vsub.s32 5, %v2035_v38  ;;  %v925_v60 = vsub.s32 2, %v2035_v38 }
 0x1aa   : > { %v2123_v57 = vpop.xlane.xlu1 %793  ;;  %v898_v9 = vsel %vm897_vm3, %v849_v0, %v896_v5 }
 0x1ab   : > { %v875_v13 = vrot.slane %v2123_v57, %v2112_v37  ;;  %v900_v17 = vsel %vm899_vm4, %v858_v12, %v898_v9 }
 0x1ac   : > { %v2131_v61 = vpop.xlane.xlu0 %787 }
 0x1ad   : > { %v862_v6 = vrot.slane %v2131_v61, %v2117_v55  ;;  %v876_v22 = vsel %vm830_vm1, %v875_v13, %v871_v18 }
 0x1ae   : > { %v2137_v1 = vpop.xlane.xlu1 %789 }
 0x1af   : > { %v866_v4 = vrot.slane %v2137_v1, %v2112_v37 }
 0x1b0   : > { %v2147_v7 = vpop.xlane.xlu0 %795 }
 0x1b1   : > { %v867_v10 = vsel %vm830_vm1, %v866_v4, %v862_v6  ;;  %v880_v16 = vrot.slane %v2147_v7, %v2117_v55 }
 0x1b2   : > { %v2153_v11 = vpop.xlane.xlu1 %797  ;;  %v902_v19 = vsel %vm901_vm5, %v867_v10, %v900_v17 }
 0x1b3   : > { %v884_v15 = vrot.slane %v2153_v11, %v2112_v37  ;;  %v904_v26 = vsel %vm903_vm6, %v876_v22, %v902_v19 }
 0x1b4   : > { %v2162_v48 = vpop.xlane.xlu0 %799 }
 0x1b5   : > { %v885_v21 = vsel %vm830_vm1, %v884_v15, %v880_v16  ;;  %v889_v23 = vrot.slane %v2162_v48, %v2117_v55 }
 0x1b6   : > { %v2168_v20 = vpop.xlane.xlu1 %801  ;;  %v906_v34 = vsel %vm905_vm7, %v885_v21, %v904_v26 }
 0x1b7   : > { %v893_v24 = vrot.slane %v2168_v20, %v2112_v37 }
 0x1b9   : > { %v894_v28 = vsel %vm830_vm1, %v893_v24, %v889_v23 }
 0x1ba   : > { %v908_v35 = vsel %vm907_vm8, %v894_v28, %v906_v34 }
 0x1bb   : > { %v911_v39 = vsel %vm910_vm9, %v908_v35, -inf }
 0x1bc   : > { %912 = vmax.xlane.f32.xlu0 %v911_v39 }
 0x245   : > { %v913_v49 = vpop.xlane.xlu0 %912 }
 0x246   : > { %v918_v51 = vrot.slane %v913_v49, %v2042_v47  ;;  %v922_v56 = vrot.slane %v913_v49, %v921_v41  ;;  %v2193_v0 = vrot.slane %v913_v49, %v937_v36  ;;  %v926_v4 = vrot.slane %v913_v49, %v925_v60 }
 0x247   : > { %v930_v15 = vrot.slane %v913_v49, %v929_v8 }
 0x248   : > { %v955_v58 = vsub.f32 %v2094_v42, %v918_v51  ;;  %v956_v59 = vsub.f32 %v2098_v44, %v918_v51  ;;  %v957_v62 = vsub.f32 %v2096_v43, %v922_v56  ;;  %v958_v5 = vsub.f32 %v2100_v45, %v922_v56 }
 0x249   : > { %v945_v44 = vsub.s32 7, %v2035_v38  ;;  %v942_v43 = vrot.slane %v913_v49, %v941_v63  ;;  %v965_v6 = vsub.f32 %v2114_v54, %v2193_v0  ;;  %v959_v9 = vsub.f32 %v2107_v52, %v926_v4 }
 0x24a   : > { %v971_v2 = vmul.f32 1.442695, %v955_v58  ;;  %v973_v3 = vmul.f32 1.442695, %v956_v59  ;;  %v975_v42 = vmul.f32 1.442695, %v957_v62  ;;  %v960_v16 = vsub.f32 %v2109_v53, %v926_v4 }
 0x24b   : > { %v977_v10 = vmul.f32 1.442695, %v958_v5  ;;  %v946_v45 = vrot.slane %v913_v49, %v945_v44  ;;  %v967_v12 = vsub.f32 %v2147_v7, %v942_v43  ;;  %v991_v13 = vmul.f32 1.442695, %v965_v6 }
 0x24c   : > { %1713 = vpow2.f32 %v971_v2  ;;  %v979_v17 = vmul.f32 1.442695, %v959_v9  ;;  %v933_v52 = vsub.s32 4, %v2035_v38  ;;  %v961_v19 = vsub.f32 %v2102_v46, %v930_v15 }
 0x24d   : > { %1715 = vpow2.f32 %v973_v3  ;;  %v969_v54 = vsub.f32 %v2162_v48, %v946_v45  ;;  %v995_v18 = vmul.f32 1.442695, %v967_v12  ;;  %v981_v21 = vmul.f32 1.442695, %v960_v16 }
 0x24e   : > { %1717 = vpow2.f32 %v975_v42  ;;  %v934_v53 = vrot.slane %v913_v49, %v933_v52  ;;  %v962_v48 = vsub.f32 %v2105_v50, %v930_v15  ;;  %v983_v24 = vmul.f32 1.442695, %v961_v19 }
 0x24f   : > { %1719 = vpow2.f32 %v977_v10  ;;  %v999_v23 = vmul.f32 1.442695, %v969_v54  ;;  %v968_v58 = vsub.f32 %v2153_v11, %v942_v43  ;;  %v1212_v38 = vunpack.c.h.bf16 %v2002_v25 }
 0x250   : > { %1721 = vpow2.f32 %v991_v13  ;;  %v963_v26 = vsub.f32 %v2131_v61, %v934_v53  ;;  %v985_v28 = vmul.f32 1.442695, %v962_v48  ;;  %v964_v39 = vsub.f32 %v2137_v1, %v934_v53 }
 0x251   : > { %1723 = vpow2.f32 %v979_v17  ;;  %v966_v61 = vsub.f32 %v2123_v57, %v2193_v0  ;;  %v970_v57 = vsub.f32 %v2168_v20, %v946_v45  ;;  %v997_v0 = vmul.f32 1.442695, %v968_v58 }
 0x252   : > { %1725 = vpow2.f32 %v995_v18  ;;  %v987_v50 = vmul.f32 1.442695, %v963_v26  ;;  %v989_v51 = vmul.f32 1.442695, %v964_v39 }
 0x253   : > { %1727 = vpow2.f32 %v981_v21  ;;  %v993_v59 = vmul.f32 1.442695, %v966_v61  ;;  %v1001_v3 = vmul.f32 1.442695, %v970_v57 }
 0x254   : > { %1729 = vpow2.f32 %v999_v23 }
 0x255   : > { %1731 = vpow2.f32 %v983_v24 }
 0x256   : > { %1733 = vpow2.f32 %v985_v28 }
 0x257   : > { %1735 = vpow2.f32 %v987_v50 }
 0x258   : > { %1737 = vpow2.f32 %v989_v51 }
 0x259   : > { %v2214_v22 = vpop.eup %1713  ;;  %1739 = vpow2.f32 %v993_v59 }
 0x25a   : > { %v2216_v7 = vpop.eup %1715  ;;  %1020 = vperm.xlu1 %1655, %v2214_v22   ;;  %1741 = vpow2.f32 %v997_v0 }
 0x25b   : > { %1023 = vperm.xlu0 %1656, %v2216_v7   ;;  %v2223_v46 = vpop.eup %1717  ;;  %1743 = vpow2.f32 %v1001_v3 }
 0x25c   : > { %v2227_v34 = vpop.eup %1719 }
 0x25d   : > { %v2230_v35 = vpop.eup %1721 }
 0x25e   : > { %1026 = vperm.xlu1 %1655, %v2223_v46   ;;  %v2234_v40 = vpop.eup %1723 }
 0x25f   : > { %1050 = vperm.xlu0 %1656, %v2230_v35   ;;  %v2237_v49 = vpop.eup %1725 }
 0x260   : > { %v2242_v56 = vpop.eup %1727 }
 0x261   : > { %v2245_v1 = vpop.eup %1729 }
 0x262   : > { %1029 = vperm.xlu1 %1655, %v2227_v34   ;;  %v2249_v62 = vpop.eup %1731 }
 0x263   : > { %1056 = vperm.xlu0 %1656, %v2237_v49   ;;  %v2253_v2 = vpop.eup %1733 }
 0x264   : > { %v2256_v4 = vpop.eup %1735 }
 0x265   : > { %v2259_v11 = vpop.eup %1737 }
 0x266   : > { %1032 = vperm.xlu1 %1655, %v2234_v40   ;;  %v2262_v5 = vpop.eup %1739 }
 0x267   : > { %1062 = vperm.xlu0 %1656, %v2245_v1   ;;  %v2265_v20 = vpop.eup %1741 }
 0x268   : > { %v2268_v42 = vpop.eup %1743 }
 0x26a   : > { %1035 = vperm.xlu1 %1655, %v2242_v56  }
 0x26e   : > { %1038 = vperm.xlu1 %1655, %v2249_v62  }
 0x272   : > { %1041 = vperm.xlu1 %1655, %v2253_v2  }
 0x276   : > { %1044 = vperm.xlu1 %1655, %v2256_v4  }
 0x27a   : > { %1047 = vperm.xlu1 %1655, %v2259_v11  }
 0x27e   : > { %1053 = vperm.xlu1 %1655, %v2262_v5  }
 0x282   : > { %1059 = vperm.xlu1 %1655, %v2265_v20  }
 0x286   : > { %1065 = vperm.xlu1 %1655, %v2268_v42  }
 0x2d5   : > { %v1021_v43 = vpop.permute.xlu1 %1020 }
 0x2d6   : > { %v1024_v13 = vpop.permute.xlu0 %1023  ;;  %v1070_v48 = vrot.slane %v1021_v43, %v2117_v55 }
 0x2d7   : > { %v1074_v53 = vrot.slane %v1024_v13, %v2112_v37 }
 0x2d9   : > { %v1027_v6 = vpop.permute.xlu1 %1026  ;;  %v1075_v0 = vsel %vm830_vm1, %v1074_v53, %v1070_v48 }
 0x2da   : > { %v1051_v17 = vpop.permute.xlu0 %1050  ;;  %v1079_v24 = vrot.slane %v1027_v6, %v2117_v55 }
 0x2db   : > { %v1115_v3 = vrot.slane %v1051_v17, %v2117_v55 }
 0x2dd   : > { %v1030_v9 = vpop.permute.xlu1 %1029 }
 0x2de   : > { %v1083_v18 = vrot.slane %v1030_v9, %v2112_v37  ;;  %v1057_v19 = vpop.permute.xlu0 %1056 }
 0x2df   : > { %v1124_v9 = vrot.slane %v1057_v19, %v2117_v55 }
 0x2e0   : > { %v1084_v50 = vsel %vm830_vm1, %v1083_v18, %v1079_v24 }
 0x2e1   : > { %v1033_v10 = vpop.permute.xlu1 %1032 }
 0x2e2   : > { %v1088_v28 = vrot.slane %v1033_v10, %v2117_v55  ;;  %v1139_v10 = vsel %vm895_vm2, %v1084_v50, %v1075_v0 }
 0x2e5   : > { %v1036_v45 = vpop.permute.xlu1 %1035 }
 0x2e6   : > { %v1092_v21 = vrot.slane %v1036_v45, %v2112_v37  ;;  %v1063_v45 = vpop.permute.xlu0 %1062 }
 0x2e7   : > { %v1133_v18 = vrot.slane %v1063_v45, %v2117_v55  ;;  %v1209_v45 = vunpack.c.l.bf16 %v1956_v14 }
 0x2e8   : > { %v1093_v58 = vsel %vm830_vm1, %v1092_v21, %v1088_v28 }
 0x2e9   : > { %v1039_v12 = vpop.permute.xlu1 %1038  ;;  %v1140_v13 = vsel %vm897_vm3, %v1093_v58, %v1139_v10  ;;  %v1218_v10 = vunpack.c.h.bf16 %v2018_v30 }
 0x2ea   : > { %v1097_v61 = vrot.slane %v1039_v12, %v2117_v55 }
 0x2ed   : > { %v1042_v15 = vpop.permute.xlu1 %1041 }
 0x2ee   : > { %v1101_v26 = vrot.slane %v1042_v15, %v2112_v37 }
 0x2f0   : > { %v1102_v43 = vsel %vm830_vm1, %v1101_v26, %v1097_v61 }
 0x2f1   : > { %v1045_v16 = vpop.permute.xlu1 %1044 }
 0x2f2   : > { %v1106_v59 = vrot.slane %v1045_v16, %v2117_v55  ;;  %v1141_v16 = vsel %vm899_vm4, %v1102_v43, %v1140_v13  ;;  %v1215_v13 = vunpack.c.l.bf16 %v2015_v29 }
 0x2f5   : > { %v1048_v54 = vpop.permute.xlu1 %1047 }
 0x2f6   : > { %v1110_v39 = vrot.slane %v1048_v54, %v2112_v37 }
 0x2f8   : > { %v1111_v12 = vsel %vm830_vm1, %v1110_v39, %v1106_v59 }
 0x2f9   : > { %v1054_v23 = vpop.permute.xlu1 %1053  ;;  %v1142_v21 = vsel %vm901_vm5, %v1111_v12, %v1141_v16 }
 0x2fa   : > { %v1119_v51 = vrot.slane %v1054_v23, %v2112_v37 }
 0x2fc   : > { %v1120_v15 = vsel %vm830_vm1, %v1119_v51, %v1115_v3 }
 0x2fd   : > { %v1060_v57 = vpop.permute.xlu1 %1059  ;;  %v1143_v23 = vsel %vm903_vm6, %v1120_v15, %v1142_v21  ;;  %v1217_v15 = vunpack.c.l.bf16 %v2018_v30  ;;  %v1220_v30 = vunpack.c.h.bf16 %v2023_v31 }
 0x2fe   : > { %v1128_v6 = vrot.slane %v1060_v57, %v2112_v37 }
 0x300   : > { %v1129_v54 = vsel %vm830_vm1, %v1128_v6, %v1124_v9  ;;  %v1216_v9 = vunpack.c.h.bf16 %v2015_v29  ;;  %v1219_v29 = vunpack.c.l.bf16 %v2023_v31  ;;  %v1222_v31 = vunpack.c.h.bf16 %v2026_v32 }
 0x301   : > { %v1066_v17 = vpop.permute.xlu1 %1065  ;;  %v1144_v48 = vsel %vm905_vm7, %v1129_v54, %v1143_v23 }
 0x302   : > { %v1137_v19 = vrot.slane %v1066_v17, %v2112_v37 }
 0x304   : > { %v1138_v53 = vsel %vm830_vm1, %v1137_v19, %v1133_v18 }
 0x305   : > { %v1145_v24 = vsel %vm907_vm8, %v1138_v53, %v1144_v48 }
 0x306   : > { %v1147_v26 = vsel %vm910_vm9, %v1145_v24, 0.0 }
 0x307   : > { %1148 = vadd.xlane.f32.xlu0 %v1147_v26 }
 0x390   : > { %v1149_v28 = vpop.xlane.xlu0 %1148 }
 0x391   : > { %1745 = vrcp.f32 %v1149_v28 }
 0x39e   : > { %v1746_v39 = vpop.eup %1745 }
 0x39f   : > { %v1172_v55 = vrot.slane %v1746_v39, %v933_v52  ;;  %v1156_v50 = vrot.slane %v1746_v39, %v2042_v47  ;;  %v1184_v51 = vrot.slane %v1746_v39, %v945_v44  ;;  %v1160_v57 = vrot.slane %v1746_v39, %v921_v41 }
 0x3a1   : > { %v1201_v37 = vmul.f32 %v2256_v4, %v1172_v55  ;;  %v1193_v61 = vmul.f32 %v2214_v22, %v1156_v50  ;;  %v1207_v58 = vmul.f32 %v2245_v1, %v1184_v51  ;;  %v1194_v59 = vmul.f32 %v2216_v7, %v1156_v50 }
 0x3a2   : > { %v1195_v47 = vmul.f32 %v2223_v46, %v1160_v57  ;;  %v1196_v52 = vmul.f32 %v2227_v34, %v1160_v57  ;;  %v1164_v22 = vrot.slane %v1746_v39, %v925_v60  ;;  %v1168_v7 = vrot.slane %v1746_v39, %v929_v8 }
 0x3a3   : > { %1267 = vperm.xlu0 %1656, %v1201_v37   ;;  %1227 = vperm.xlu1 %1655, %v1193_v61   ;;  %v1202_v34 = vmul.f32 %v2259_v11, %v1172_v55  ;;  %v1176_v60 = vrot.slane %v1746_v39, %v937_v36  ;;  %v1180_v8 = vrot.slane %v1746_v39, %v941_v63  ;;  %v1214_v63 = vunpack.c.h.bf16 %v2009_v27 }
 0x3a4   : > { %v1197_v44 = vmul.f32 %v2234_v40, %v1164_v22  ;;  %v1198_v1 = vmul.f32 %v2242_v56, %v1164_v22  ;;  %v1199_v41 = vmul.f32 %v2249_v62, %v1168_v7  ;;  %v1200_v46 = vmul.f32 %v2253_v2, %v1168_v7 }
 0x3a5   : > { %v1203_v40 = vmul.f32 %v2230_v35, %v1176_v60  ;;  %v1204_v56 = vmul.f32 %v2262_v5, %v1176_v60  ;;  %v1205_v62 = vmul.f32 %v2237_v49, %v1180_v8  ;;  %v1206_v2 = vmul.f32 %v2265_v20, %v1180_v8 }
 0x3a6   : > { %v1208_v4 = vmul.f32 %v2268_v42, %v1184_v51  ;;  %v1210_v49 = vunpack.c.h.bf16 %v1956_v14  ;;  %v1211_v20 = vunpack.c.l.bf16 %v2002_v25  ;;  %v1213_v42 = vunpack.c.l.bf16 %v2009_v27 }
 0x3a7   : > { %1297 = vperm.xlu0 %1656, %v1207_v58   ;;  %1232 = vperm.xlu1 %1655, %v1194_v59   ;;  %v1223_v8 = vunpack.c.l.bf16 %v2031_v33 }
 0x3ab   : > { %1237 = vperm.xlu1 %1655, %v1195_v47  }
 0x3af   : > { %1242 = vperm.xlu1 %1655, %v1196_v52  }
 0x3b3   : > { %1247 = vperm.xlu1 %1655, %v1197_v44  }
 0x3b7   : > { %1252 = vperm.xlu1 %1655, %v1198_v1   ;;  %v1221_v1 = vunpack.c.l.bf16 %v2026_v32 }
 0x3bb   : > { %1257 = vperm.xlu1 %1655, %v1199_v41  }
 0x3bf   : > { %1262 = vperm.xlu1 %1655, %v1200_v46  }
 0x3c3   : > { %1272 = vperm.xlu1 %1655, %v1202_v34  }
 0x3c7   : > { %1277 = vperm.xlu1 %1655, %v1203_v40  }
 0x3cb   : > { %1282 = vperm.xlu1 %1655, %v1204_v56  }
 0x3cf   : > { %1287 = vperm.xlu1 %1655, %v1205_v62  }
 0x3d3   : > { %1292 = vperm.xlu1 %1655, %v1206_v2  }
 0x3d7   : > { %1302 = vperm.xlu1 %1655, %v1208_v4   ;;  %v1224_v4 = vunpack.c.h.bf16 %v2031_v33 }
 0x41e   : > { %v1228_v36 = vpop.permute.xlu1 %1227  ;;  %v1268_v17 = vpop.permute.xlu0 %1267 }
 0x41f   : > { %v1305_v53 = vmul.f32 %v1228_v36, %v1209_v45  ;;  %v1313_v24 = vmul.f32 %v1268_v17, %v1217_v15 }
 0x422   : > { %v1233_v11 = vpop.permute.xlu1 %1232  ;;  %v1298_v36 = vpop.permute.xlu0 %1297 }
 0x423   : > { %v1306_v18 = vmul.f32 %v1233_v11, %v1210_v49  ;;  %v1319_v32 = vmul.f32 %v1298_v36, %v1223_v8 }
 0x425   : > { %v1321_v14 = vadd.f32 %v1306_v18, %v1305_v53 }
 0x426   : > { %v1238_v0 = vpop.permute.xlu1 %1237 }
 0x427   : > { %v1307_v21 = vmul.f32 %v1238_v0, %v1211_v20  ;;  %v1322_v51 = vrot.slane %v1321_v14, 4 }
 0x429   : > { %v1323_v41 = vadd.f32 %v1322_v51, %v1321_v14 }
 0x42a   : > { %v1243_v35 = vpop.permute.xlu1 %1242 }
 0x42b   : > { %v1308_v12 = vmul.f32 %v1243_v35, %v1212_v38  ;;  %v1324_v11 = vrot.slane %v1323_v41, 2 }
 0x42d   : > { %v1328_v48 = vadd.f32 %v1308_v12, %v1307_v21  ;;  %v1325_v20 = vadd.f32 %v1324_v11, %v1323_v41 }
 0x42e   : > { %v1248_v3 = vpop.permute.xlu1 %1247 }
 0x42f   : > { %v1309_v25 = vmul.f32 %v1248_v3, %v1213_v42  ;;  %v1329_v50 = vrot.slane %v1328_v48, 4 }
 0x431   : > { %v1330_v52 = vadd.f32 %v1329_v50, %v1328_v48 }
 0x432   : > { %v1253_v43 = vpop.permute.xlu1 %1252 }
 0x433   : > { %v1310_v16 = vmul.f32 %v1253_v43, %v1214_v63  ;;  %v1331_v40 = vrot.slane %v1330_v52, 2 }
 0x435   : > { %v1335_v26 = vadd.f32 %v1310_v16, %v1309_v25 }
 0x436   : > { %v1258_v5 = vpop.permute.xlu1 %1257 }
 0x437   : > { %v1311_v27 = vmul.f32 %v1258_v5, %v1215_v13  ;;  %v1336_v37 = vrot.slane %v1335_v26, 4  ;;  %v1332_v5 = vadd.f32 %v1331_v40, %v1330_v52 }
 0x439   : > { %v1337_v44 = vadd.f32 %v1336_v37, %v1335_v26  ;;  %v1333_v33 = vrot.slane %v1332_v5, 1 }
 0x43a   : > { %v1263_v6 = vpop.permute.xlu1 %1262 }
 0x43b   : > { %v1312_v19 = vmul.f32 %v1263_v6, %v1216_v9  ;;  %v1338_v62 = vrot.slane %v1337_v44, 2  ;;  %v1334_v25 = vadd.f32 %v1333_v33, %v1332_v5 }
 0x43d   : > { %v1342_v39 = vadd.f32 %v1312_v19, %v1311_v27  ;;  %v1339_v6 = vadd.f32 %v1338_v62, %v1337_v44 }
 0x43e   : > { %v1273_v54 = vpop.permute.xlu1 %1272 }
 0x43f   : > { %v1314_v23 = vmul.f32 %v1273_v54, %v1218_v10  ;;  %v1343_v58 = vrot.slane %v1342_v39, 4  ;;  %v1340_v16 = vrot.slane %v1339_v6, 1  ;;  %v1326_v54 = vrot.slane %v1325_v20, 1 }
 0x441   : > { %v1349_v55 = vadd.f32 %v1314_v23, %v1313_v24  ;;  %v1344_v46 = vadd.f32 %v1343_v58, %v1342_v39  ;;  %v1341_v27 = vadd.f32 %v1340_v16, %v1339_v6  ;;  %v1327_v24 = vadd.f32 %v1326_v54, %v1325_v20 }
 0x442   : > { %v1278_v28 = vpop.permute.xlu1 %1277 }
 0x443   : > { %v1315_v59 = vmul.f32 %v1278_v28, %v1219_v29  ;;  %v1350_v47 = vrot.slane %v1349_v55, 4  ;;  %v1345_v0 = vrot.slane %v1344_v46, 2  ;;  %v1385_v29 = vsel %vm895_vm2, %v1334_v25, %v1327_v24 }
 0x444   : > { %v1386_v50 = vsel %vm897_vm3, %v1341_v27, %v1385_v29 }
 0x445   : > { %v1351_v60 = vadd.f32 %v1350_v47, %v1349_v55  ;;  %v1346_v9 = vadd.f32 %v1345_v0, %v1344_v46 }
 0x446   : > { %v1283_v61 = vpop.permute.xlu1 %1282 }
 0x447   : > { %v1316_v57 = vmul.f32 %v1283_v61, %v1220_v30  ;;  %v1352_v43 = vrot.slane %v1351_v60, 2  ;;  %v1347_v17 = vrot.slane %v1346_v9, 1 }
 0x449   : > { %v1356_v22 = vadd.f32 %v1316_v57, %v1315_v59  ;;  %v1353_v45 = vadd.f32 %v1352_v43, %v1351_v60  ;;  %v1348_v26 = vadd.f32 %v1347_v17, %v1346_v9 }
 0x44a   : > { %v1288_v7 = vpop.permute.xlu1 %1287 }
 0x44b   : > { %v1357_v34 = vrot.slane %v1356_v22, 4  ;;  %v1317_v35 = vmul.f32 %v1288_v7, %v1221_v1  ;;  %v1354_v19 = vrot.slane %v1353_v45, 1  ;;  %v1387_v61 = vsel %vm899_vm4, %v1348_v26, %v1386_v50 }
 0x44d   : > { %v1358_v56 = vadd.f32 %v1357_v34, %v1356_v22  ;;  %v1355_v39 = vadd.f32 %v1354_v19, %v1353_v45 }
 0x44e   : > { %v1293_v2 = vpop.permute.xlu1 %1292 }
 0x44f   : > { %v1318_v3 = vmul.f32 %v1293_v2, %v1222_v31  ;;  %v1359_v38 = vrot.slane %v1358_v56, 2  ;;  %v1388_v58 = vsel %vm901_vm5, %v1355_v39, %v1387_v61 }
 0x451   : > { %v1363_v63 = vadd.f32 %v1318_v3, %v1317_v35  ;;  %v1360_v12 = vadd.f32 %v1359_v38, %v1358_v56 }
 0x452   : > { %v1303_v49 = vpop.permute.xlu1 %1302 }
 0x453   : > { %v1364_v42 = vrot.slane %v1363_v63, 4  ;;  %v1320_v10 = vmul.f32 %v1303_v49, %v1224_v4  ;;  %v1361_v23 = vrot.slane %v1360_v12, 1 }
 0x455   : > { %v1365_v13 = vadd.f32 %v1364_v42, %v1363_v63  ;;  %v1370_v15 = vadd.f32 %v1320_v10, %v1319_v32  ;;  %v1362_v30 = vadd.f32 %v1361_v23, %v1360_v12 }
 0x457   : > { %v1366_v18 = vrot.slane %v1365_v13, 2  ;;  %v1371_v21 = vrot.slane %v1370_v15, 4  ;;  %v1389_v57 = vsel %vm903_vm6, %v1362_v30, %v1388_v58 }
 0x459   : > { %v1367_v53 = vadd.f32 %v1366_v18, %v1365_v13  ;;  %v1372_v48 = vadd.f32 %v1371_v21, %v1370_v15 }
 0x45b   : > { %v1368_v28 = vrot.slane %v1367_v53, 1  ;;  %v1373_v14 = vrot.slane %v1372_v48, 2 }
 0x45d   : > { %v1374_v55 = vadd.f32 %v1373_v14, %v1372_v48  ;;  %v1369_v37 = vadd.f32 %v1368_v28, %v1367_v53 }
 0x45f   : > { %v1375_v51 = vrot.slane %v1374_v55, 1  ;;  %v1390_v47 = vsel %vm905_vm7, %v1369_v37, %v1389_v57 }
 0x461   : > { %v1376_v59 = vadd.f32 %v1375_v51, %v1374_v55 }
 0x463   : > { %v1391_v52 = vsel %vm907_vm8, %v1376_v59, %v1390_v47 }
 0x464   : > { %1393 = vst [vmem:[%s287_s13] sm:$0xff] %v1391_v52 }
 0x465   : > { %1760 = shalt.err (!%p1757_p4)
}
 0x466   : > { %s1761_s21 = scalar_lea.hbm %s2363_s16, 128  ;;  %s1765_s19 = scalar_lea.hbm %s2408_s7, 256 }
 0x467   : > { %p1762_p7 = scmp.ne.s32.totalorder %s2363_s16, %s1761_s21  ;;  %p1766_p10 = scmp.lt.s32.totalorder %s2363_s16, %s2408_s7 }
 0x468   : > { %p1767_p11 = scmp.lt.s32.totalorder %s1765_s19, %s1761_s21 }
 0x469   : > { %p1763_p8 = pnand %p1762_p7, %p1892_p5 }
 0x46a   : > { %p1768_p12 = por %p1767_p11, %p1766_p10 }
 0x46b   : > { %p1764_p9 = pneg %p1763_p8 }
 0x46d   : > { %p1769_p13 = pnand %p1768_p12, %p1764_p9 }
 0x46f   : > { %1772 = shalt.err (!%p1769_p13)
}
 0x470   : > { %1612 = dma.vmem_to_hbm [thread:$0]  (%p1892_p5), %s1409_s8, 128, %s2363_s16, %s1395_s28  }
 0x471 PF: > { %p1618_p0 = scmp.ge.s32.totalorder %s1807_s27, 2  ;;  %s1420_s14 = sand.u32 1, %s1795_s24  }
 0x472   : > { %s1421_s15 = scalar_lea.sflag [#allocation3], %s1420_s14 }
 0x473   : > { %p1615_p1 = pnand %p1618_p0, %p1896_p6 }
 0x475   : > { %p1616_p2 = pneg %p1615_p1 }
 0x477   : > { %1790 = dma.done.wait (%p1616_p2), %s1421_s15, 128  }
 0x478   : > { %1792 = vsyncadd (%p1616_p2), %s1421_s15, 4294967168  ;;  %p17_p3 = scmp.ge.s32.totalorder %s1879_s30, 4   ;;  %s2411_s24 = smov %s1799_s25 }
 0x479   : > { %s2412_s25 = smov %s1803_s26  ;;  %s2413_s26 = smov %s1890_s10 }
 0x47a   : > { %s2414_s27 = smov %s1879_s30  ;;  %19 = sbr.rel (!%p17_p3) target bundleno = 3 (0x3), region = 86 }
 0x47f   :  { %1426 = vsyncpa [#allocation3], 1 }
 0x480   :  { %1428 = vsyncpa [#allocation3 + $0x1], 1 }

</bundles_post_ra>
